<compile_context>
chip_gen: v7x
topology: tpu7x:2x2x1
jax: 0.10.0
libtpu: 0.0.40
codegen_flags: <defaults>
</compile_context>

<pallas_src>
import functools
import math

import jax
import jax.numpy as jnp
from jax.experimental import pallas as pl
from jax.experimental.pallas import tpu as pltpu


def _round_up(n: int, m: int) -> int:
    return ((n + m - 1) // m) * m


def _cdiv(a: int, b: int) -> int:
    return -(-a // b)


@functools.lru_cache(maxsize=1)
def _tpu_config():
    """Returns (num_tensorcores, lane/MXU alignment, usable VMEM ceiling bytes)."""
    vmem_cap = 128 * 2**20
    kind = ""
    try:
        info = pltpu.get_tpu_info()
        vmem_cap = int(getattr(info, "vmem_capacity_bytes", vmem_cap))
    except Exception:
        pass
    try:
        kind = jax.devices()[0].device_kind.lower()
    except Exception:
        pass
    is_v7 = ("v7" in kind) or ("tpu7" in kind) or (vmem_cap <= 64 * 2**20)
    is_v5 = "v5" in kind
    num_tc = 2 if is_v7 else 1
    lane_align = 128 if is_v5 else 256          # MXU 128x128 (v5e) vs 256x256 (v6e/v7x)
    if is_v7:
        # 64 MiB physical per TC: leave headroom for Mosaic scratch / DMA bookkeeping.
        ceiling = min(vmem_cap - 12 * 2**20, 52 * 2**20)
    else:
        # 128 MiB physical on v5e/v6e.
        ceiling = min(int(vmem_cap * 0.85), 112 * 2**20)
    ceiling = max(ceiling, 24 * 2**20)
    return num_tc, lane_align, ceiling


def _maybe_pad(a, shape):
    pads = tuple((0, t - s) for s, t in zip(a.shape, shape))
    if any(p for _, p in pads):
        a = jnp.pad(a, pads)                     # exact: padded units contribute zero
    return a


def _vmem_estimate(tm, tk, dm_p, itemsize, f32_out):
    """Honest VMEM estimate: double-buffered tiles + h intermediate + accumulator."""
    wslab = 2 * (dm_p * tk + tk * dm_p + tk) * itemsize   # W1 + W2 + b1 slabs (x2 buffers)
    xo = 2 * 2 * tm * dm_p * itemsize                     # x tile + out tile (x2 buffers)
    b2 = 2 * dm_p * itemsize
    h = tm * tk * 4 + (0 if f32_out else tm * tk * itemsize)   # f32 h (+ cast copy)
    acc = 0 if f32_out else tm * dm_p * 4                       # f32 scratch accumulator
    return wslab + xo + b2 + h + acc


def _select_tiles(M, dm_p, dff_p, itemsize, f32_out, num_tc, vmem_budget):
    sub = 16 if itemsize < 4 else 8              # sublane pack: 16 rows for bf16, 8 for f32

    # tile_k: largest divisor of dff_p (multiple of 128) whose double-buffered
    # weight slabs stay within ~45% of the VMEM budget (VMEM-aware, d_model-aware).
    cands = [d for d in range(128, dff_p + 1, 128) if dff_p % d == 0]
    weight_budget = int(vmem_budget * 0.45)
    tile_k = cands[0]
    for c in sorted(cands, reverse=True):
        if 2 * (2 * dm_p * c + c) * itemsize <= weight_budget:
            tile_k = c
            break

    # tile_m: as large as the remaining budget allows (weight re-streaming per call
    # scales with the number of row tiles), capped at 2048, sublane aligned.
    max_tm = min(_round_up(M, sub), 2048)
    tm = max_tm
    while tm > sub and _vmem_estimate(tm, tile_k, dm_p, itemsize, f32_out) > vmem_budget:
        tm -= sub
    tile_m = max(tm, sub)

    # Megacore: on 2-TC chips make sure the "parallel" row axis has >= num_tc tiles.
    while num_tc > 1 and tile_m > sub and _cdiv(_round_up(M, sub), tile_m) < num_tc:
        tile_m = max(_round_up(tile_m // 2, sub), sub)

    return tile_m, tile_k


# --------------------------------------------------------------------------------------
# Kernels
# --------------------------------------------------------------------------------------
def _ffn_kernel_f32out(x_ref, w1_ref, b1_ref, w2_ref, b2_ref, o_ref):
    """float32 output: accumulate directly into the resident output block."""
    k = pl.program_id(1)

    @pl.when(k == 0)
    def _():
        o_ref[...] = jnp.zeros_like(o_ref)

    h = jnp.dot(x_ref[...], w1_ref[...], preferred_element_type=jnp.float32)
    h = jnp.maximum(h + b1_ref[...], 0.0)        # b1 slab is (1, tile_k)
    # Dropout = identity at inference time.
    o_ref[...] += jnp.dot(h, w2_ref[...], preferred_element_type=jnp.float32)

    @pl.when(k == pl.num_programs(1) - 1)
    def _():
        o_ref[...] += b2_ref[...]


def _ffn_kernel_acc(x_ref, w1_ref, b1_ref, w2_ref, b2_ref, o_ref, acc_ref):
    """Narrow output dtypes: f32 scratch accumulator, cast + store at the last k."""
    k = pl.program_id(1)

    @pl.when(k == 0)
    def _():
        acc_ref[...] = jnp.zeros_like(acc_ref)

    h = jnp.dot(x_ref[...], w1_ref[...], preferred_element_type=jnp.float32)
    h = jnp.maximum(h + b1_ref[...], 0.0)
    # Dropout = identity at inference time.
    acc_ref[...] += jnp.dot(h.astype(x_ref.dtype), w2_ref[...],
                            preferred_element_type=jnp.float32)

    @pl.when(k == pl.num_programs(1) - 1)
    def _():
        o_ref[...] = (acc_ref[...] + b2_ref[...]).astype(o_ref.dtype)


# --------------------------------------------------------------------------------------
# Host-side wrappers
# --------------------------------------------------------------------------------------
def prepare_ffn_params(w1, b1, w2, b2):
    """Pre-pad FFN parameters once (hoists weight padding out of the forward path)."""
    _, lane_align, _ = _tpu_config()
    dm_p = _round_up(w1.shape[0], lane_align)
    dff_p = _round_up(w1.shape[1], lane_align)
    w1p = _maybe_pad(w1, (dm_p, dff_p))
    b1p = _maybe_pad(jnp.reshape(b1, (1, -1)), (1, dff_p))
    w2p = _maybe_pad(w2, (dff_p, dm_p))
    b2p = _maybe_pad(jnp.reshape(b2, (1, -1)), (1, dm_p))
    return w1p, b1p, w2p, b2p


@jax.jit
def feed_forward_block(x, w1, b1, w2, b2):
    """relu(x @ w1 + b1) @ w2 + b2 (dropout = identity at inference).

    x: (..., d_model). Weights may be raw ((d_model, d_ff) / (d_ff, d_model)) or
    pre-padded via prepare_ffn_params() — pre-padding keeps per-call HBM traffic
    down since the padding then happens once at init time.
    """
    num_tc, lane_align, vmem_ceiling = _tpu_config()

    orig_shape = x.shape
    d_model = orig_shape[-1]
    M = math.prod(orig_shape[:-1])
    itemsize = jnp.dtype(x.dtype).itemsize
    f32_out = x.dtype == jnp.float32

    dm_p = _round_up(w1.shape[0], lane_align)
    dff_p = _round_up(w1.shape[1], lane_align)

    # No-ops when pre-padded weights are passed.
    w1p = _maybe_pad(w1, (dm_p, dff_p))
    b1p = _maybe_pad(jnp.reshape(b1, (1, -1)), (1, dff_p))
    w2p = _maybe_pad(w2, (dff_p, dm_p))
    b2p = _maybe_pad(jnp.reshape(b2, (1, -1)), (1, dm_p))

    vmem_budget = int(vmem_ceiling * 0.9)
    tile_m, tile_k = _select_tiles(M, dm_p, dff_p, itemsize, f32_out, num_tc, vmem_budget)

    M_p = _round_up(M, tile_m)
    x2d = _maybe_pad(x.reshape(M, d_model), (M_p, dm_p))

    grid = (M_p // tile_m, dff_p // tile_k)

    est = _vmem_estimate(tile_m, tile_k, dm_p, itemsize, f32_out)
    vmem_limit = int(min(max(int(est * 1.25), 32 * 2**20), vmem_ceiling))

    cost = pl.CostEstimate(
        flops=4 * M_p * dm_p * dff_p,                       # two matmuls
        transcendentals=0,
        bytes_accessed=(2 * M_p * dm_p * itemsize           # x in + out
                        + grid[0] * (w1p.size + w2p.size + b1p.size) * itemsize
                        + b2p.size * itemsize),
    )

    in_specs = [
        pl.BlockSpec((tile_m, dm_p), lambda i, k: (i, 0)),   # x rows
        pl.BlockSpec((dm_p, tile_k), lambda i, k: (0, k)),   # W1 slab
        pl.BlockSpec((1, tile_k), lambda i, k: (0, k)),      # b1 slab
        pl.BlockSpec((tile_k, dm_p), lambda i, k: (k, 0)),   # W2 slab
        pl.BlockSpec((1, dm_p), lambda i, k: (0, 0)),        # b2
    ]
    out_spec = pl.BlockSpec((tile_m, dm_p), lambda i, k: (i, 0))

    if f32_out:
        kernel = _ffn_kernel_f32out
        scratch = []
    else:
        kernel = _ffn_kernel_acc
        scratch = [pltpu.VMEM((tile_m, dm_p), jnp.float32)]

    out2d = pl.pallas_call(
        kernel,
        out_shape=jax.ShapeDtypeStruct((M_p, dm_p), x.dtype),
        grid_spec=pltpu.PrefetchScalarGridSpec(
            num_scalar_prefetch=0,
            grid=grid,
            in_specs=in_specs,
            out_specs=out_spec,
            scratch_shapes=scratch,
        ),
        compiler_params=pltpu.CompilerParams(
            dimension_semantics=("parallel", "arbitrary"),
            vmem_limit_bytes=vmem_limit,
        ),
        cost_estimate=cost,
    )(x2d, w1p, b1p, w2p, b2p)

    return out2d[:M, :d_model].reshape(orig_shape)


def init_params(key, d_model, d_ff, dtype=jnp.float32):
    """Deterministic init mirroring nn.Linear (weights stored transposed)."""
    k1, k2, k3, k4 = jax.random.split(key, 4)
    bound1 = 1.0 / (d_model ** 0.5)
    bound2 = 1.0 / (d_ff ** 0.5)
    w1 = jax.random.uniform(k1, (d_model, d_ff), dtype, -bound1, bound1)
    b1 = jax.random.uniform(k2, (d_ff,), dtype, -bound1, bound1)
    w2 = jax.random.uniform(k3, (d_ff, d_model), dtype, -bound2, bound2)
    b2 = jax.random.uniform(k4, (d_model,), dtype, -bound2, bound2)
    return w1, b1, w2, b2


if __name__ == "__main__":
    batch, seq, d_model, d_ff = 2, 8, 32, 64

    key = jax.random.PRNGKey(0)
    kx, kp = jax.random.split(key)
    x = jax.random.normal(kx, (batch, seq, d_model), jnp.float32)
    w1, b1, w2, b2 = init_params(kp, d_model, d_ff)

    # Pure-JAX reference of the same semantics (dropout = identity).
    ref = jnp.maximum(x @ w1 + b1, 0.0) @ w2 + b2

    # ---- float32 path (direct output accumulation), pre-padded weights ----
    w1p, b1p, w2p, b2p = prepare_ffn_params(w1, b1, w2, b2)
    out = feed_forward_block(x, w1p, b1p, w2p, b2p)
    out = jax.block_until_ready(out)
    assert out.shape == (batch, seq, d_model)
    assert jnp.allclose(out, ref, atol=1e-5, rtol=1e-5)

    # ---- bf16 path (f32 scratch accumulator), unpadded weights ----
    xb = x.astype(jnp.bfloat16)
    w1b, b1b, w2b, b2b = (a.astype(jnp.bfloat16) for a in (w1, b1, w2, b2))
    out_bf = feed_forward_block(xb, w1b, b1b, w2b, b2b)
    out_bf = jax.block_until_ready(out_bf)
    ref_bf = (jnp.maximum(xb.astype(jnp.float32) @ w1b.astype(jnp.float32)
                          + b1b.astype(jnp.float32), 0.0)
              @ w2b.astype(jnp.float32) + b2b.astype(jnp.float32))
    assert out_bf.shape == (batch, seq, d_model)
    assert jnp.allclose(out_bf.astype(jnp.float32), ref_bf, atol=5e-2, rtol=5e-2)

    print("KERNEL_OK")
</pallas_src>

<mosaic_0001>
module attributes {stable_mosaic.version = 11 : i64} {
  func.func @_ffn_kernel_f32out(%arg0: i32, %arg1: i32, %arg2: memref<16x256xf32, #tpu.memory_space<vmem>>, %arg3: memref<256x256xf32, #tpu.memory_space<vmem>>, %arg4: memref<1x256xf32, #tpu.memory_space<vmem>>, %arg5: memref<256x256xf32, #tpu.memory_space<vmem>>, %arg6: memref<1x256xf32, #tpu.memory_space<vmem>>, %arg7: memref<16x256xf32, #tpu.memory_space<vmem>>) attributes {dimension_semantics = [#tpu.dimension_semantics<parallel>, #tpu.dimension_semantics<arbitrary>], iteration_bounds = array<i64: 1, 1>, scalar_prefetch = 0 : i64, scratch_operands = 0 : i64, tpu.core_type = #tpu.core_type<tc>, window_params = [{transform_indices = @transform_0, window_bounds = array<i64: 16, 256>}, {transform_indices = @transform_1, window_bounds = array<i64: 256, 256>}, {transform_indices = @transform_2, window_bounds = array<i64: 1, 256>}, {transform_indices = @transform_3, window_bounds = array<i64: 256, 256>}, {pipeline_mode = #tpu.pipeline_mode<synchronous>, transform_indices = @transform_4, window_bounds = array<i64: 1, 256>}, {transform_indices = @transform_5, window_bounds = array<i64: 16, 256>}]} {
    %c0_i32 = arith.constant 0 : i32
    %0 = arith.cmpi eq, %arg1, %c0_i32 : i32
    %1 = arith.extui %0 : i1 to i32
    %c0_i32_0 = arith.constant 0 : i32
    %2 = arith.cmpi ne, %1, %c0_i32_0 : i32
    scf.if %2 {
      %cst_16 = arith.constant 0.000000e+00 : f32
      %19 = vector.broadcast %cst_16 : f32 to vector<16x256xf32>
      %c0_17 = arith.constant 0 : index
      %c0_18 = arith.constant 0 : index
      %20 = vector.load %arg7[%c0_17, %c0_18] : memref<16x256xf32, #tpu.memory_space<vmem>>, vector<16x256xf32>
      tpu.vector_store %arg7[%c0_17, %c0_18], %19 {strides = array<i32>} : memref<16x256xf32, #tpu.memory_space<vmem>>, vector<16x256xf32>,
    } else {
    }
    %c0 = arith.constant 0 : index
    %c0_1 = arith.constant 0 : index
    %3 = vector.load %arg2[%c0, %c0_1] : memref<16x256xf32, #tpu.memory_space<vmem>>, vector<16x256xf32>
    %c0_2 = arith.constant 0 : index
    %c0_3 = arith.constant 0 : index
    %4 = vector.load %arg3[%c0_2, %c0_3] : memref<256x256xf32, #tpu.memory_space<vmem>>, vector<256x256xf32>
    %cst = arith.constant dense<0.000000e+00> : vector<16x256xf32>
    %5 = tpu.matmul %3, %4, %cst {dimension_numbers = #tpu.dot_dimension_numbers<[1], [0], [0], [1], [0, 0, 1, 1], [], []>} : vector<16x256xf32>, vector<256x256xf32>, vector<16x256xf32> -> vector<16x256xf32>
    %c0_4 = arith.constant 0 : index
    %c0_5 = arith.constant 0 : index
    %6 = vector.load %arg4[%c0_4, %c0_5] : memref<1x256xf32, #tpu.memory_space<vmem>>, vector<1x256xf32>
    %7 = vector.broadcast %6 : vector<1x256xf32> to vector<16x256xf32>
    %8 = arith.addf %5, %7 : vector<16x256xf32>
    %cst_6 = arith.constant 0.000000e+00 : f32
    %9 = vector.broadcast %cst_6 : f32 to vector<16x256xf32>
    %10 = arith.maximumf %8, %9 : vector<16x256xf32>
    %c0_7 = arith.constant 0 : index
    %c0_8 = arith.constant 0 : index
    %11 = vector.load %arg7[%c0_7, %c0_8] : memref<16x256xf32, #tpu.memory_space<vmem>>, vector<16x256xf32>
    %c0_9 = arith.constant 0 : index
    %c0_10 = arith.constant 0 : index
    %12 = vector.load %arg5[%c0_9, %c0_10] : memref<256x256xf32, #tpu.memory_space<vmem>>, vector<256x256xf32>
    %cst_11 = arith.constant dense<0.000000e+00> : vector<16x256xf32>
    %13 = tpu.matmul %10, %12, %cst_11 {dimension_numbers = #tpu.dot_dimension_numbers<[1], [0], [0], [1], [0, 0, 1, 1], [], []>} : vector<16x256xf32>, vector<256x256xf32>, vector<16x256xf32> -> vector<16x256xf32>
    %14 = arith.addf %11, %13 : vector<16x256xf32>
    %c0_12 = arith.constant 0 : index
    %c0_13 = arith.constant 0 : index
    %15 = vector.load %arg7[%c0_12, %c0_13] : memref<16x256xf32, #tpu.memory_space<vmem>>, vector<16x256xf32>
    tpu.vector_store %arg7[%c0_12, %c0_13], %14 {strides = array<i32>} : memref<16x256xf32, #tpu.memory_space<vmem>>, vector<16x256xf32>,
    %c0_i32_14 = arith.constant 0 : i32
    %16 = arith.cmpi eq, %arg1, %c0_i32_14 : i32
    %17 = arith.extui %16 : i1 to i32
    %c0_i32_15 = arith.constant 0 : i32
    %18 = arith.cmpi ne, %17, %c0_i32_15 : i32
    scf.if %18 {
      %c0_16 = arith.constant 0 : index
      %c0_17 = arith.constant 0 : index
      %19 = vector.load %arg7[%c0_16, %c0_17] : memref<16x256xf32, #tpu.memory_space<vmem>>, vector<16x256xf32>
      %c0_18 = arith.constant 0 : index
      %c0_19 = arith.constant 0 : index
      %20 = vector.load %arg6[%c0_18, %c0_19] : memref<1x256xf32, #tpu.memory_space<vmem>>, vector<1x256xf32>
      %21 = vector.broadcast %20 : vector<1x256xf32> to vector<16x256xf32>
      %22 = arith.addf %19, %21 : vector<16x256xf32>
      %c0_20 = arith.constant 0 : index
      %c0_21 = arith.constant 0 : index
      %23 = vector.load %arg7[%c0_20, %c0_21] : memref<16x256xf32, #tpu.memory_space<vmem>>, vector<16x256xf32>
      tpu.vector_store %arg7[%c0_20, %c0_21], %22 {strides = array<i32>} : memref<16x256xf32, #tpu.memory_space<vmem>>, vector<16x256xf32>,
    } else {
    }
    return
  }
  func.func @transform_0(%arg0: i32, %arg1: i32) -> (i32, i32) {
    %c0_i32 = arith.constant 0 : i32
    %c0_i32_0 = arith.constant 0 : i32
    return %arg0, %c0_i32 : i32, i32
  }
  func.func @transform_1(%arg0: i32, %arg1: i32) -> (i32, i32) {
    %c0_i32 = arith.constant 0 : i32
    %c0_i32_0 = arith.constant 0 : i32
    return %c0_i32, %arg1 : i32, i32
  }
  func.func @transform_2(%arg0: i32, %arg1: i32) -> (i32, i32) {
    %c0_i32 = arith.constant 0 : i32
    %c0_i32_0 = arith.constant 0 : i32
    return %c0_i32, %arg1 : i32, i32
  }
  func.func @transform_3(%arg0: i32, %arg1: i32) -> (i32, i32) {
    %c0_i32 = arith.constant 0 : i32
    %c0_i32_0 = arith.constant 0 : i32
    return %arg1, %c0_i32 : i32, i32
  }
  func.func @transform_4(%arg0: i32, %arg1: i32) -> (i32, i32) {
    %c0_i32 = arith.constant 0 : i32
    %c0_i32_0 = arith.constant 0 : i32
    %c0_i32_1 = arith.constant 0 : i32
    return %c0_i32, %c0_i32_0 : i32, i32
  }
  func.func @transform_5(%arg0: i32, %arg1: i32) -> (i32, i32) {
    %c0_i32 = arith.constant 0 : i32
    %c0_i32_0 = arith.constant 0 : i32
    return %arg0, %c0_i32 : i32, i32
  }
}

</mosaic_0001>

<bundles_post_ra>
// kernel: feed_forward_block.1
= control target key start
LH: loop header
LB: loop body
LE: loop exit
PB: predicated region body
PF: predicated region fallthrough
CT: control target
= control target key end

     0   :  { %10 = vsyncpa [#allocation3], 0  ;;  %s672_s0 = inlined_call_operand.vmem [shape: f32[16,256], index: 0, kind: input, shape index: {}]   ;;  %s673_s1 = inlined_call_operand.hbm [shape: f32[256,256], index: 1, kind: input, shape index: {}]   ;;  %s674_s2 = inlined_call_operand.vmem [shape: f32[1,256], index: 2, kind: input, shape index: {}]   ;;  %s675_s3 = inlined_call_operand.hbm [shape: f32[256,256], index: 3, kind: input, shape index: {}]   ;;  %s676_s4 = inlined_call_operand.vmem [shape: f32[1,256], index: 4, kind: input, shape index: {}]   ;;  %s677_s5 = inlined_call_operand.vmem [shape: f32[16,256], index: 5, kind: output, shape index: {}]  }
   0x1   :  { %11 = vsyncpa [#allocation5], 0  ;;  %s584_s18 = smov [#allocation2]   ;;  %s536_s22 = scalar_lea.hbm %s673_s1, 8192 }
   0x2   :  { %s19_s19 = sshll.u32 %s584_s18, 4  ;;  %p537_p0 = scmp.ne.s32.totalorder %s673_s1, %s536_s22  ;;  %s20_s19 = int_to_ptr.vmem [resolvable:$true] %s19_s19 }
   0x3   :  { %p540_p1 = scmp.lt.u32.totalorder %s536_s22, %s673_s1 }
   0x5   :  { %p542_p2 = pnand %p540_p1, %p537_p0 }
   0x7   :  { %545 = shalt.err (!%p542_p2)
}
   0x8   :  { %s546_s27 = scalar_lea.vmem %s20_s19, 8192  ;;  %p551_p4 = scmp.lt.s32.totalorder %s20_s19, %s20_s19 }
   0x9   :  { %p547_p3 = scmp.ne.s32.totalorder %s20_s19, %s546_s27  ;;  %p552_p5 = scmp.lt.s32.totalorder %s546_s27, %s546_s27 }
   0xb   :  { %p553_p6 = por %p552_p5, %p551_p4 }
   0xd   :  { %p554_p7 = pnand %p553_p6, %p547_p3 }
   0xf   :  { %557 = shalt.err (!%p554_p7)
}
  0x10   :  { %s585_s28 = smov 256   ;;  %s586_s29 = smov 16  }
  0x11   :  { %25 = dma.hbm_to_vmem [thread:$0]  %s673_s1, 8192, %s20_s19, [#allocation3], %s585_s28, %s585_s28, %s586_s29  }
  0x12   :  { %s587_s7 = smov [#allocation4]   ;;  %s558_s11 = scalar_lea.hbm %s675_s3, 8192 }
  0x13   :  { %s33_s8 = sshll.u32 %s587_s7, 4  ;;  %p559_p8 = scmp.ne.s32.totalorder %s675_s3, %s558_s11  ;;  %s34_s8 = int_to_ptr.vmem [resolvable:$true] %s33_s8 }
  0x14   :  { %p562_p9 = scmp.lt.u32.totalorder %s558_s11, %s675_s3 }
  0x16   :  { %p564_p10 = pnand %p562_p9, %p559_p8 }
  0x18   :  { %567 = shalt.err (!%p564_p10)
}
  0x19   :  { %s568_s16 = scalar_lea.vmem %s34_s8, 8192  ;;  %p573_p12 = scmp.lt.s32.totalorder %s34_s8, %s34_s8 }
  0x1a   :  { %p569_p11 = scmp.ne.s32.totalorder %s34_s8, %s568_s16  ;;  %p574_p13 = scmp.lt.s32.totalorder %s568_s16, %s568_s16 }
  0x1c   :  { %p575_p0 = por %p574_p13, %p573_p12 }
  0x1e   :  { %p576_p1 = pnand %p575_p0, %p569_p11 }
  0x20   :  { %579 = shalt.err (!%p576_p1)
}
  0x21   :  { %39 = dma.hbm_to_vmem [thread:$0]  %s675_s3, 8192, %s34_s8, [#allocation5], %s585_s28, %s585_s28, %s586_s29  }
  0x22   :  { %580 = dma.done.wait [#allocation3], 8192  }
  0x23   :  { %581 = vsyncadd [#allocation3], 4294959104 }
  0x24   :  { %582 = dma.done.wait [#allocation5], 8192  }
  0x25   :  { %583 = vsyncadd [#allocation5], 4294959104  ;;  %v61_v0 = vld [vmem:[#allocation2 + $0x8] sm:$0xff]  ;;  %v63_v1 = vld [vmem:[#allocation2 + $0x18] sm:$0xff] }
  0x26   :  { %v60_v2 = vld [vmem:[#allocation2] sm:$0xff]  ;;  %v403_v3 = vpack.c.bf16 %v63_v1, %v61_v0  ;;  %v62_v4 = vld [vmem:[#allocation2 + $0x10] sm:$0xff]  ;;  %v65_v5 = vld [vmem:[#allocation2 + $0x28] sm:$0xff] }
  0x27   :  { %v67_v6 = vld [vmem:[#allocation2 + $0x38] sm:$0xff]  ;;  %v405_v7 = vpack.c.bf16 %v62_v4, %v60_v2  ;;  %v64_v9 = vld [vmem:[#allocation2 + $0x20] sm:$0xff]  ;;  %v66_v10 = vld [vmem:[#allocation2 + $0x30] sm:$0xff] }
  0x28   :  { %v407_v8 = vpack.c.bf16 %v67_v6, %v65_v5  ;;  %v69_v11 = vld [vmem:[#allocation2 + $0x48] sm:$0xff]  ;;  %404 = vmatprep.subr.bf16.mxu0 %v403_v3  ;;  %v71_v12 = vld [vmem:[#allocation2 + $0x58] sm:$0xff]  ;;  %v409_v13 = vpack.c.bf16 %v66_v10, %v64_v9  ;;  %v68_v15 = vld [vmem:[#allocation2 + $0x40] sm:$0xff] }
  0x29   :  { %406 = vmatpush1.bf16.msra.mxu0 %v405_v7  ;;  %v411_v14 = vpack.c.bf16 %v71_v12, %v69_v11  ;;  %v70_v16 = vld [vmem:[#allocation2 + $0x50] sm:$0xff]  ;;  %v73_v17 = vld [vmem:[#allocation2 + $0x68] sm:$0xff]  ;;  %v75_v18 = vld [vmem:[#allocation2 + $0x78] sm:$0xff] }
  0x2a   :  { %408 = vmatprep.subr.bf16.mxu0 %v407_v8  ;;  %v413_v19 = vpack.c.bf16 %v70_v16, %v68_v15  ;;  %v415_v20 = vpack.c.bf16 %v75_v18, %v73_v17  ;;  %v72_v21 = vld [vmem:[#allocation2 + $0x60] sm:$0xff]  ;;  %v74_v22 = vld [vmem:[#allocation2 + $0x70] sm:$0xff]  ;;  %v77_v23 = vld [vmem:[#allocation2 + $0x88] sm:$0xff] }
  0x2b   :  { %v79_v24 = vld [vmem:[#allocation2 + $0x98] sm:$0xff]  ;;  %v417_v25 = vpack.c.bf16 %v74_v22, %v72_v21  ;;  %v76_v27 = vld [vmem:[#allocation2 + $0x80] sm:$0xff]  ;;  %v78_v28 = vld [vmem:[#allocation2 + $0x90] sm:$0xff] }
  0x2c   :  { %v419_v26 = vpack.c.bf16 %v79_v24, %v77_v23  ;;  %v81_v29 = vld [vmem:[#allocation2 + $0xa8] sm:$0xff]  ;;  %v83_v30 = vld [vmem:[#allocation2 + $0xb8] sm:$0xff]  ;;  %v421_v31 = vpack.c.bf16 %v78_v28, %v76_v27  ;;  %v80_v33 = vld [vmem:[#allocation2 + $0xa0] sm:$0xff] }
  0x2d   :  { %410 = vmatpush1.bf16.msra.mxu0 %v409_v13  ;;  %v423_v32 = vpack.c.bf16 %v83_v30, %v81_v29  ;;  %v82_v34 = vld [vmem:[#allocation2 + $0xb0] sm:$0xff]  ;;  %v85_v35 = vld [vmem:[#allocation2 + $0xc8] sm:$0xff]  ;;  %v87_v36 = vld [vmem:[#allocation2 + $0xd8] sm:$0xff] }
  0x2e   :  { %412 = vmatprep.subr.bf16.mxu0 %v411_v14  ;;  %v425_v37 = vpack.c.bf16 %v82_v34, %v80_v33  ;;  %v427_v38 = vpack.c.bf16 %v87_v36, %v85_v35  ;;  %v84_v39 = vld [vmem:[#allocation2 + $0xc0] sm:$0xff]  ;;  %v86_v40 = vld [vmem:[#allocation2 + $0xd0] sm:$0xff]  ;;  %v57_v41 = vld [vmem:[%s672_s0 + $0x8] sm:$0xff] }
  0x2f   :  { %v89_v42 = vld [vmem:[#allocation2 + $0xe8] sm:$0xff]  ;;  %v91_v43 = vld [vmem:[#allocation2 + $0xf8] sm:$0xff]  ;;  %200 = vmatprep.mubr.f32.mxu0 %v57_v41  ;;  %v88_v45 = vld [vmem:[#allocation2 + $0xe0] sm:$0xff]  ;;  %v429_v50 = vpack.c.bf16 %v86_v40, %v84_v39 }
  0x30   :  { %v222_v44 = vld [vmem:[#allocation4 + $0x8] sm:$0xff]  ;;  %v90_v46 = vld [vmem:[#allocation2 + $0xf0] sm:$0xff]  ;;  %v224_v47 = vld [vmem:[#allocation4 + $0x18] sm:$0xff]  ;;  %v431_v56 = vpack.c.bf16 %v91_v43, %v89_v42 }
  0x31   :  { %414 = vmatpush1.bf16.msra.mxu0 %v413_v19  ;;  %v221_v48 = vld [vmem:[#allocation4] sm:$0xff]  ;;  %v223_v49 = vld [vmem:[#allocation4 + $0x10] sm:$0xff]  ;;  %v467_v51 = vpack.c.bf16 %v224_v47, %v222_v44  ;;  %v226_v53 = vld [vmem:[#allocation4 + $0x28] sm:$0xff]  ;;  %v433_v0 = vpack.c.bf16 %v90_v46, %v88_v45 }
  0x32   :  { %416 = vmatprep.subr.bf16.mxu0 %v415_v20  ;;  %v469_v52 = vpack.c.bf16 %v223_v49, %v221_v48  ;;  %v228_v54 = vld [vmem:[#allocation4 + $0x38] sm:$0xff]  ;;  %v225_v55 = vld [vmem:[#allocation4 + $0x20] sm:$0xff]  ;;  %v227_v58 = vld [vmem:[#allocation4 + $0x30] sm:$0xff] }
  0x33   :  { %v471_v57 = vpack.c.bf16 %v228_v54, %v226_v53  ;;  %v230_v59 = vld [vmem:[#allocation4 + $0x48] sm:$0xff]  ;;  %v232_v60 = vld [vmem:[#allocation4 + $0x58] sm:$0xff]  ;;  %468 = vmatprep.subr.bf16.mxu1 %v467_v51  ;;  %v473_v63 = vpack.c.bf16 %v227_v58, %v225_v55  ;;  %v92_v1 = vld [vmem:[#allocation2 + $0x100] sm:$0xff] }
  0x34   :  { %v93_v61 = vld [vmem:[#allocation2 + $0x108] sm:$0xff]  ;;  %v95_v62 = vld [vmem:[#allocation2 + $0x118] sm:$0xff]  ;;  %470 = vmatpush1.bf16.msra.mxu1 %v469_v52  ;;  %v475_v2 = vpack.c.bf16 %v232_v60, %v230_v59  ;;  %v229_v3 = vld [vmem:[#allocation4 + $0x40] sm:$0xff] }
  0x35   :  { %418 = vmatpush1.bf16.msra.mxu0 %v417_v25  ;;  %472 = vmatprep.subr.bf16.mxu1 %v471_v57  ;;  %v231_v4 = vld [vmem:[#allocation4 + $0x50] sm:$0xff]  ;;  %v435_v5 = vpack.c.bf16 %v95_v62, %v93_v61  ;;  %v234_v7 = vld [vmem:[#allocation4 + $0x68] sm:$0xff]  ;;  %v236_v8 = vld [vmem:[#allocation4 + $0x78] sm:$0xff] }
  0x36   :  { %420 = vmatprep.subr.bf16.mxu0 %v419_v26  ;;  %v94_v6 = vld [vmem:[#allocation2 + $0x110] sm:$0xff]  ;;  %v97_v9 = vld [vmem:[#allocation2 + $0x128] sm:$0xff]  ;;  %v99_v10 = vld [vmem:[#allocation2 + $0x138] sm:$0xff]  ;;  %v477_v11 = vpack.c.bf16 %v231_v4, %v229_v3  ;;  %v479_v14 = vpack.c.bf16 %v236_v8, %v234_v7 }
  0x37   :  { %v437_v12 = vpack.c.bf16 %v94_v6, %v92_v1  ;;  %v96_v13 = vld [vmem:[#allocation2 + $0x120] sm:$0xff]  ;;  %v235_v16 = vld [vmem:[#allocation4 + $0x70] sm:$0xff]  ;;  %v439_v17 = vpack.c.bf16 %v99_v10, %v97_v9  ;;  %v238_v19 = vld [vmem:[#allocation4 + $0x88] sm:$0xff] }
  0x38   :  { %474 = vmatpush1.bf16.msra.mxu1 %v473_v63  ;;  %v233_v15 = vld [vmem:[#allocation4 + $0x60] sm:$0xff]  ;;  %v98_v18 = vld [vmem:[#allocation2 + $0x130] sm:$0xff]  ;;  %v240_v20 = vld [vmem:[#allocation4 + $0x98] sm:$0xff] }
  0x39   :  { %422 = vmatpush1.bf16.msra.mxu0 %v421_v31  ;;  %476 = vmatprep.subr.bf16.mxu1 %v475_v2  ;;  %v101_v21 = vld [vmem:[#allocation2 + $0x148] sm:$0xff]  ;;  %v103_v22 = vld [vmem:[#allocation2 + $0x158] sm:$0xff]  ;;  %v481_v23 = vpack.c.bf16 %v235_v16, %v233_v15  ;;  %v441_v24 = vpack.c.bf16 %v98_v18, %v96_v13  ;;  %v100_v25 = vld [vmem:[#allocation2 + $0x140] sm:$0xff]  ;;  %v483_v26 = vpack.c.bf16 %v240_v20, %v238_v19 }
  0x3a   :  { %424 = vmatprep.subr.bf16.mxu0 %v423_v32  ;;  %v237_v27 = vld [vmem:[#allocation4 + $0x80] sm:$0xff]  ;;  %v239_v28 = vld [vmem:[#allocation4 + $0x90] sm:$0xff]  ;;  %v443_v29 = vpack.c.bf16 %v103_v22, %v101_v21  ;;  %v242_v31 = vld [vmem:[#allocation4 + $0xa8] sm:$0xff] }
  0x3b   :  { %v102_v30 = vld [vmem:[#allocation2 + $0x150] sm:$0xff]  ;;  %v244_v32 = vld [vmem:[#allocation4 + $0xb8] sm:$0xff]  ;;  %v105_v33 = vld [vmem:[#allocation2 + $0x168] sm:$0xff]  ;;  %v485_v35 = vpack.c.bf16 %v239_v28, %v237_v27 }
  0x3c   :  { %478 = vmatpush1.bf16.msra.mxu1 %v477_v11  ;;  %v107_v34 = vld [vmem:[#allocation2 + $0x178] sm:$0xff]  ;;  %v445_v36 = vpack.c.bf16 %v102_v30, %v100_v25  ;;  %v241_v39 = vld [vmem:[#allocation4 + $0xa0] sm:$0xff]  ;;  %v243_v40 = vld [vmem:[#allocation4 + $0xb0] sm:$0xff] }
  0x3d   :  { %426 = vmatpush1.bf16.msra.mxu0 %v425_v37  ;;  %480 = vmatprep.subr.bf16.mxu1 %v479_v14  ;;  %v104_v37 = vld [vmem:[#allocation2 + $0x160] sm:$0xff]  ;;  %v447_v41 = vpack.c.bf16 %v107_v34, %v105_v33  ;;  %v106_v42 = vld [vmem:[#allocation2 + $0x170] sm:$0xff]  ;;  %v246_v43 = vld [vmem:[#allocation4 + $0xc8] sm:$0xff]  ;;  %v489_v47 = vpack.c.bf16 %v243_v40, %v241_v39 }
  0x3e   :  { %428 = vmatprep.subr.bf16.mxu0 %v427_v38  ;;  %v487_v38 = vpack.c.bf16 %v244_v32, %v242_v31  ;;  %v248_v44 = vld [vmem:[#allocation4 + $0xd8] sm:$0xff]  ;;  %v109_v45 = vld [vmem:[#allocation2 + $0x188] sm:$0xff]  ;;  %v449_v48 = vpack.c.bf16 %v106_v42, %v104_v37  ;;  %v108_v49 = vld [vmem:[#allocation2 + $0x180] sm:$0xff] }
  0x3f   :  { %v111_v46 = vld [vmem:[#allocation2 + $0x198] sm:$0xff]  ;;  %v245_v51 = vld [vmem:[#allocation4 + $0xc0] sm:$0xff]  ;;  %v247_v52 = vld [vmem:[#allocation4 + $0xd0] sm:$0xff] }
  0x40   :  { %482 = vmatpush1.bf16.msra.mxu1 %v481_v23  ;;  %v451_v53 = vpack.c.bf16 %v111_v46, %v109_v45  ;;  %v110_v54 = vld [vmem:[#allocation2 + $0x190] sm:$0xff]  ;;  %v250_v55 = vld [vmem:[#allocation4 + $0xe8] sm:$0xff]  ;;  %v115_v58 = vld [vmem:[#allocation2 + $0x1b8] sm:$0xff]  ;;  %v493_v59 = vpack.c.bf16 %v247_v52, %v245_v51 }
  0x41   :  { %430 = vmatpush1.bf16.msra.mxu0 %v429_v50  ;;  %484 = vmatprep.subr.bf16.mxu1 %v483_v26  ;;  %v491_v50 = vpack.c.bf16 %v248_v44, %v246_v43  ;;  %v113_v57 = vld [vmem:[#allocation2 + $0x1a8] sm:$0xff]  ;;  %v453_v60 = vpack.c.bf16 %v110_v54, %v108_v49  ;;  %v112_v61 = vld [vmem:[#allocation2 + $0x1a0] sm:$0xff]  ;;  %v114_v2 = vld [vmem:[#allocation2 + $0x1b0] sm:$0xff] }
  0x42   :  { %432 = vmatprep.subr.bf16.mxu0 %v431_v56  ;;  %v252_v56 = vld [vmem:[#allocation4 + $0xf8] sm:$0xff]  ;;  %v249_v63 = vld [vmem:[#allocation4 + $0xe0] sm:$0xff]  ;;  %v455_v1 = vpack.c.bf16 %v115_v58, %v113_v57  ;;  %v254_v3 = vld [vmem:[#allocation4 + $0x108] sm:$0xff]  ;;  %v457_v8 = vpack.c.bf16 %v114_v2, %v112_v61 }
  0x43   :  { %v495_v62 = vpack.c.bf16 %v252_v56, %v250_v55  ;;  %v256_v4 = vld [vmem:[#allocation4 + $0x118] sm:$0xff]  ;;  %v116_v9 = vld [vmem:[#allocation2 + $0x1c0] sm:$0xff]  ;;  %v118_v14 = vld [vmem:[#allocation2 + $0x1d0] sm:$0xff] }
  0x44   :  { %486 = vmatpush1.bf16.msra.mxu1 %v485_v35  ;;  %v119_v6 = vld [vmem:[#allocation2 + $0x1d8] sm:$0xff]  ;;  %v499_v10 = vpack.c.bf16 %v256_v4, %v254_v3  ;;  %v253_v11 = vld [vmem:[#allocation4 + $0x100] sm:$0xff]  ;;  %v258_v15 = vld [vmem:[#allocation4 + $0x128] sm:$0xff]  ;;  %v461_v20 = vpack.c.bf16 %v118_v14, %v116_v9  ;;  %v126_v4 = vlaneseq }
  0x45   :  { %434 = vmatpush1.bf16.msra.mxu0 %v433_v0  ;;  %488 = vmatprep.subr.bf16.mxu1 %v487_v38  ;;  %v251_v0 = vld [vmem:[#allocation4 + $0xf0] sm:$0xff]  ;;  %v260_v16 = vld [vmem:[#allocation4 + $0x138] sm:$0xff]  ;;  %v120_v21 = vld [vmem:[#allocation2 + $0x1e0] sm:$0xff] }
  0x46   :  { %436 = vmatprep.subr.bf16.mxu0 %v435_v5  ;;  %v117_v5 = vld [vmem:[#allocation2 + $0x1c8] sm:$0xff]  ;;  %v497_v7 = vpack.c.bf16 %v251_v0, %v249_v63  ;;  %v123_v18 = vld [vmem:[#allocation2 + $0x1f8] sm:$0xff]  ;;  %v503_v22 = vpack.c.bf16 %v260_v16, %v258_v15  ;;  %v257_v23 = vld [vmem:[#allocation4 + $0x120] sm:$0xff] }
  0x47   :  { %v459_v13 = vpack.c.bf16 %v119_v6, %v117_v5  ;;  %v122_v26 = vld [vmem:[#allocation2 + $0x1f0] sm:$0xff]  ;;  %v262_v27 = vld [vmem:[#allocation4 + $0x148] sm:$0xff]  ;;  %v264_v28 = vld [vmem:[#allocation4 + $0x158] sm:$0xff]  ;;  %v127_v5 = vshrl.u32 %v126_v4, 7 }
  0x48   :  { %490 = vmatpush1.bf16.msra.mxu1 %v489_v47  ;;  %v465_v30 = vpack.c.bf16 %v122_v26, %v120_v21  ;;  %v507_v31 = vpack.c.bf16 %v264_v28, %v262_v27  ;;  %v261_v32 = vld [vmem:[#allocation4 + $0x140] sm:$0xff]  ;;  %v263_v33 = vld [vmem:[#allocation4 + $0x150] sm:$0xff]  ;;  %v266_v34 = vld [vmem:[#allocation4 + $0x168] sm:$0xff] }
  0x49   :  { %438 = vmatpush1.bf16.msra.mxu0 %v437_v12  ;;  %492 = vmatprep.subr.bf16.mxu1 %v491_v50  ;;  %v255_v12 = vld [vmem:[#allocation4 + $0x110] sm:$0xff]  ;;  %v268_v35 = vld [vmem:[#allocation4 + $0x178] sm:$0xff]  ;;  %v56_v37 = vld [vmem:[%s672_s0] sm:$0xff]  ;;  %v128_v6 = vsub.s32 0, %v127_v5 }
  0x4a   :  { %440 = vmatprep.subr.bf16.mxu0 %v439_v17  ;;  %v121_v17 = vld [vmem:[#allocation2 + $0x1e8] sm:$0xff]  ;;  %v501_v19 = vpack.c.bf16 %v255_v12, %v253_v11  ;;  %v511_v38 = vpack.c.bf16 %v268_v35, %v266_v34  ;;  %v265_v39 = vld [vmem:[#allocation4 + $0x160] sm:$0xff]  ;;  %v267_v40 = vld [vmem:[#allocation4 + $0x170] sm:$0xff] }
  0x4b   :  { %v463_v25 = vpack.c.bf16 %v123_v18, %v121_v17  ;;  %v270_v42 = vld [vmem:[#allocation4 + $0x188] sm:$0xff]  ;;  %v272_v43 = vld [vmem:[#allocation4 + $0x198] sm:$0xff]  ;;  %v513_v44 = vpack.c.bf16 %v267_v40, %v265_v39  ;;  %v58_v45 = vld [vmem:[%s672_s0 + $0x10] sm:$0xff] }
  0x4c   :  { %494 = vmatpush1.bf16.msra.mxu1 %v493_v59  ;;  %v515_v46 = vpack.c.bf16 %v272_v43, %v270_v42  ;;  %v269_v47 = vld [vmem:[#allocation4 + $0x180] sm:$0xff]  ;;  %v274_v49 = vld [vmem:[#allocation4 + $0x1a8] sm:$0xff]  ;;  %v276_v50 = vld [vmem:[#allocation4 + $0x1b8] sm:$0xff] }
  0x4d   :  { %442 = vmatpush1.bf16.msra.mxu0 %v441_v24  ;;  %496 = vmatprep.subr.bf16.mxu1 %v495_v62  ;;  %v259_v24 = vld [vmem:[#allocation4 + $0x130] sm:$0xff]  ;;  %v519_v52 = vpack.c.bf16 %v276_v50, %v274_v49  ;;  %v278_v55 = vld [vmem:[#allocation4 + $0x1c8] sm:$0xff]  ;;  %v280_v56 = vld [vmem:[#allocation4 + $0x1d8] sm:$0xff] }
  0x4e   :  { %444 = vmatprep.subr.bf16.mxu0 %v443_v29  ;;  %v505_v29 = vpack.c.bf16 %v259_v24, %v257_v23  ;;  %v275_v54 = vld [vmem:[#allocation4 + $0x1b0] sm:$0xff]  ;;  %v523_v58 = vpack.c.bf16 %v280_v56, %v278_v55  ;;  %v277_v59 = vld [vmem:[#allocation4 + $0x1c0] sm:$0xff]  ;;  %v282_v62 = vld [vmem:[#allocation4 + $0x1e8] sm:$0xff] }
  0x4f   :  { %v284_v63 = vld [vmem:[#allocation4 + $0x1f8] sm:$0xff]  ;;  %v283_v2 = vld [vmem:[#allocation4 + $0x1f0] sm:$0xff]  ;;  %v377_v23 = vld [vmem:[%s676_s4] sm:$0x3] }
  0x50   :  { %498 = vmatpush1.bf16.msra.mxu1 %v497_v7  ;;  %v527_v0 = vpack.c.bf16 %v284_v63, %v282_v62  ;;  %v124_v7 = vld [vmem:[%s674_s2] sm:$0x3]  ;;  %v382_v24 = vrot.slane %v377_v23, %v128_v6 }
  0x51   :  { %446 = vmatpush1.bf16.msra.mxu0 %v445_v36  ;;  %500 = vmatprep.subr.bf16.mxu1 %v499_v10  ;;  %v509_v36 = vpack.c.bf16 %v263_v33, %v261_v32  ;;  %v129_v9 = vrot.slane %v124_v7, %v128_v6 }
  0x52   :  { %448 = vmatprep.subr.bf16.mxu0 %v447_v41  ;;  %v59_v41 = vld [vmem:[%s672_s0 + $0x18] sm:$0xff] }
  0x54   :  { %502 = vmatpush1.bf16.msra.mxu1 %v501_v19 }
  0x55   :  { %450 = vmatpush1.bf16.msra.mxu0 %v449_v48  ;;  %504 = vmatprep.subr.bf16.mxu1 %v503_v22  ;;  %v271_v48 = vld [vmem:[#allocation4 + $0x190] sm:$0xff] }
  0x56   :  { %452 = vmatprep.subr.bf16.mxu0 %v451_v53  ;;  %v517_v51 = vpack.c.bf16 %v271_v48, %v269_v47  ;;  %v273_v53 = vld [vmem:[#allocation4 + $0x1a0] sm:$0xff] }
  0x57   :  { %v521_v57 = vpack.c.bf16 %v275_v54, %v273_v53 }
  0x58   :  { %506 = vmatpush1.bf16.msra.mxu1 %v505_v29 }
  0x59   :  { %454 = vmatpush1.bf16.msra.mxu0 %v453_v60  ;;  %508 = vmatprep.subr.bf16.mxu1 %v507_v31  ;;  %v279_v60 = vld [vmem:[#allocation4 + $0x1d0] sm:$0xff] }
  0x5a   :  { %456 = vmatprep.subr.bf16.mxu0 %v455_v1  ;;  %v525_v61 = vpack.c.bf16 %v279_v60, %v277_v59  ;;  %v281_v1 = vld [vmem:[#allocation4 + $0x1e0] sm:$0xff] }
  0x5b   :  { %v529_v3 = vpack.c.bf16 %v283_v2, %v281_v1 }
  0x5c   :  { %510 = vmatpush1.bf16.msra.mxu1 %v509_v36 }
  0x5d   :  { %458 = vmatpush1.bf16.msra.mxu0 %v457_v8  ;;  %512 = vmatprep.subr.bf16.mxu1 %v511_v38  ;;  %v132_v8 = vsub.s32 1, %v127_v5 }
  0x5e   :  { %460 = vmatprep.subr.bf16.mxu0 %v459_v13 }
  0x5f   :  { %v133_v10 = vrot.slane %v124_v7, %v132_v8 }
  0x60   :  { %514 = vmatpush1.bf16.msra.mxu1 %v513_v44 }
  0x61   :  { %462 = vmatpush1.bf16.msra.mxu0 %v461_v20  ;;  %516 = vmatprep.subr.bf16.mxu1 %v515_v46 }
  0x62   :  { %464 = vmatprep.subr.bf16.mxu0 %v463_v25  ;;  %v386_v25 = vrot.slane %v377_v23, %v132_v8 }
  0x64   :  { %518 = vmatpush1.bf16.msra.mxu1 %v517_v51 }
  0x65   :  { %466 = vmatpush1.bf16.msra.mxu0 %v465_v30  ;;  %520 = vmatprep.subr.bf16.mxu1 %v519_v52 }
  0x68   :  { %201 = vmatmul.mubr.f32.vlgmr.msra.gmra.mrb[0].mxu0 %v56_v37  ;;  %522 = vmatpush1.bf16.msra.mxu1 %v521_v57 }
  0x69   :  { %206 = vmatprep.mubr.f32.mxu0 %v59_v41  ;;  %524 = vmatprep.subr.bf16.mxu1 %v523_v58 }
  0x6c   :  { %207 = vmatmul.mubr.f32.gmra.mrb[2].mxu0 %v58_v45  ;;  %526 = vmatpush1.bf16.msra.mxu1 %v525_v61 }
  0x6d   :  { %528 = vmatprep.subr.bf16.mxu1 %v527_v0 }
  0x70   :  { %530 = vmatpush1.bf16.msra.mxu1 %v529_v3 }
 0x13b   :  { %v202_v11 = vpop.f32.mrb[0].mxu0 }
 0x13c   :  { %v203_v12 = vadd.f32 %v202_v11, %v129_v9  ;;  %v204_v13 = vpop.f32.mrb[1].mxu0 }
 0x13d   :  { %v205_v14 = vadd.f32 %v204_v13, %v133_v10 }
 0x13e   :  { %v213_v17 = vmax.f32 %v203_v12, 0.0 }
 0x13f   :  { %v208_v15 = vpop.f32.mrb[2].mxu0  ;;  %v214_v16 = vmax.f32 %v205_v14, 0.0 }
 0x140   :  { %v209_v18 = vadd.f32 %v208_v15, %v129_v9  ;;  %v210_v19 = vpop.f32.mrb[3].mxu0 }
 0x141   :  { %v211_v20 = vadd.f32 %v210_v19, %v133_v10  ;;  %349 = vmatprep.mubr.f32.mxu1 %v214_v16 }
 0x142   :  { %350 = vmatmul.mubr.f32.vlgmr.msra.gmra.mrb[0].mxu1 %v213_v17  ;;  %v215_v22 = vmax.f32 %v209_v18, 0.0 }
 0x143   :  { %v216_v21 = vmax.f32 %v211_v20, 0.0 }
 0x145   :  { %355 = vmatprep.mubr.f32.mxu1 %v216_v21 }
 0x146   :  { %356 = vmatmul.mubr.f32.gmra.mrb[2].mxu1 %v215_v22 }
 0x215   :  { %v351_v26 = vpop.f32.mrb[0].mxu1 }
 0x216   :  { %v353_v27 = vpop.f32.mrb[1].mxu1  ;;  %v389_v28 = vadd.f32 %v382_v24, %v351_v26 }
 0x217   :  { %v390_v29 = vadd.f32 %v386_v25, %v353_v27 }
 0x218   :  { %393 = vst [vmem:[%s677_s5] sm:$0xff] %v389_v28 }
 0x219   :  { %v357_v30 = vpop.f32.mrb[2].mxu1  ;;  %394 = vst [vmem:[%s677_s5 + $0x8] sm:$0xff] %v390_v29 }
 0x21a   :  { %v359_v31 = vpop.f32.mrb[3].mxu1  ;;  %v391_v32 = vadd.f32 %v382_v24, %v357_v30 }
 0x21b   :  { %v392_v33 = vadd.f32 %v386_v25, %v359_v31 }
 0x21c   :  { %395 = vst [vmem:[%s677_s5 + $0x10] sm:$0xff] %v391_v32 }
 0x21d   :  { %396 = vst [vmem:[%s677_s5 + $0x18] sm:$0xff] %v392_v33 }
 0x21e   :  { %401 = vsyncpa [#allocation3], 1 }
 0x21f   :  { %402 = vsyncpa [#allocation5], 1 }

</bundles_post_ra>
